<compile_context>
chip_gen: v6e
topology: v6e:2x2x1
jax: 0.10.0
libtpu: 0.0.40
codegen_flags: <defaults>
</compile_context>

<pallas_src>
import functools

import jax
import jax.numpy as jnp
from jax.experimental import pallas as pl
from jax.experimental.pallas import tpu as pltpu

EPS = 1e-06
LANES = 128
SUBLANES = 8
TARGET_BLOCK_ROWS = 4096   # (4096, 128) f32 == 2 MiB per input per grid step.
MAX_CORES = 2              # v7x has 2 TensorCores; harmless loop on v5e/v6e.


def _charbonnier_kernel(x_ref, y_ref, out_ref, *, block_rows, rows,
                        blocks_per_core, edge_start, needs_mask):
    """Accumulates sum(sqrt((x - y)^2 + eps)) into a per-core (1,8,128) partial."""
    c = pl.program_id(0)
    i = pl.program_id(1)

    @pl.when(i == 0)
    def _init():
        out_ref[...] = jnp.zeros_like(out_ref)

    x = x_ref[...].astype(jnp.float32)
    y = y_ref[...].astype(jnp.float32)
    diff = x - y
    err = jnp.sqrt(diff * diff + jnp.float32(EPS))

    def _accumulate(e):
        # Regroup into vreg-sized (8, 128) slabs and add them: pure VPU vreg
        # adds (no XLU), and the running accumulator is a single vreg per core.
        partial = jnp.sum(e.reshape(block_rows // SUBLANES, SUBLANES, LANES),
                          axis=0)
        out_ref[...] += partial[None]

    if needs_mask:
        block = c * blocks_per_core + i  # logical (un-clamped) block index

        @pl.when(block >= edge_start)
        def _masked():
            row = jax.lax.broadcasted_iota(jnp.int32, err.shape, 0)
            valid = (block * block_rows + row) < rows
            # Keep this a select: masked lanes may hold garbage (NaN/Inf).
            _accumulate(jnp.where(valid, err, jnp.float32(0.0)))

        @pl.when(block < edge_start)
        def _unmasked():
            _accumulate(err)
    else:
        _accumulate(err)


def _round_up(v, m):
    return -(-v // m) * m


def _sublane_multiple(dtype):
    # f32 -> 8, bf16 -> 16, int8/fp8 -> 32 (packed-sublane tiling).
    return max(SUBLANES, 32 // jnp.dtype(dtype).itemsize)


def l1_charbonnier_loss(x, y):
    """Equivalent of L1_Charbonnier_loss.forward(X, Y)."""
    assert x.shape == y.shape, "X and Y must have the same shape"
    n = x.size
    xf = x.reshape(-1)
    yf = y.reshape(-1)

    rows = n // LANES          # full 128-wide rows handled by the kernel
    tail = n - rows * LANES    # < 128 leftover elements handled in jnp

    total = jnp.float32(0.0)

    if rows > 0:
        n_main = rows * LANES
        # TODO(synk): when n % 128 != 0 the prefix slice below makes XLA
        # materialize an operand copy; a fully zero-copy ragged path would
        # need a 1-D / manual-DMA layout that is not worth it for a scalar
        # loss (the common aligned case, incl. the test shape, is zero-copy).
        x2d = (xf if tail == 0 else xf[:n_main]).reshape(rows, LANES)
        y2d = (yf if tail == 0 else yf[:n_main]).reshape(rows, LANES)

        sub = max(_sublane_multiple(x.dtype), _sublane_multiple(y.dtype))
        block_rows = min(TARGET_BLOCK_ROWS, _round_up(rows, sub))
        num_blocks = pl.cdiv(rows, block_rows)

        num_cores = MAX_CORES if num_blocks >= MAX_CORES else 1
        blocks_per_core = pl.cdiv(num_blocks, num_cores)
        total_blocks = num_cores * blocks_per_core

        needs_mask = (total_blocks * block_rows) != rows
        edge_start = rows // block_rows     # first block needing a mask
        last_block = num_blocks - 1

        def in_index_map(c, i):
            # Clamp so a possible fully out-of-range trailing block on the
            # last core reads valid memory; its contribution is masked to 0.
            return (jnp.minimum(c * blocks_per_core + i, last_block), 0)

        kernel = functools.partial(
            _charbonnier_kernel,
            block_rows=block_rows,
            rows=rows,
            blocks_per_core=blocks_per_core,
            edge_start=edge_start,
            needs_mask=needs_mask,
        )

        in_bytes = jnp.dtype(x.dtype).itemsize + jnp.dtype(y.dtype).itemsize
        partials = pl.pallas_call(
            kernel,
            out_shape=jax.ShapeDtypeStruct((num_cores, SUBLANES, LANES),
                                           jnp.float32),
            grid=(num_cores, blocks_per_core),
            in_specs=[
                pl.BlockSpec((block_rows, LANES), in_index_map),
                pl.BlockSpec((block_rows, LANES), in_index_map),
            ],
            out_specs=pl.BlockSpec((1, SUBLANES, LANES),
                                   lambda c, i: (c, 0, 0)),
            compiler_params=pltpu.CompilerParams(
                dimension_semantics=("parallel", "arbitrary"),
            ),
            cost_estimate=pl.CostEstimate(
                flops=4 * n_main,
                transcendentals=n_main,
                bytes_accessed=n_main * in_bytes
                + num_cores * SUBLANES * LANES * 4,
            ),
        )(x2d, y2d)
        total = total + jnp.sum(partials)

    if tail > 0:
        dx = (xf[rows * LANES:].astype(jnp.float32)
              - yf[rows * LANES:].astype(jnp.float32))
        total = total + jnp.sum(jnp.sqrt(dx * dx + jnp.float32(EPS)))

    return (total / jnp.float32(n)).astype(jnp.float32)


if __name__ == "__main__":
    key = jax.random.PRNGKey(0)
    kx, ky = jax.random.split(key)
    shape = (2, 4, 16, 16)  # NCHW
    X = jax.random.normal(kx, shape, dtype=jnp.float32)
    Y = jax.random.normal(ky, shape, dtype=jnp.float32)

    loss = l1_charbonnier_loss(X, Y)
    jax.block_until_ready(loss)

    # Pure-JAX reference check.
    ref = jnp.mean(jnp.sqrt((X - Y) ** 2 + EPS))
    assert jnp.allclose(loss, ref, rtol=1e-5, atol=1e-6), (loss, ref)

    print("KERNEL_OK")
</pallas_src>

<mosaic_0001>
module attributes {stable_mosaic.version = 11 : i64} {
  func.func @_charbonnier_kernel(%arg0: i32, %arg1: i32, %arg2: memref<16x128xf32, #tpu.memory_space<vmem>>, %arg3: memref<16x128xf32, #tpu.memory_space<vmem>>, %arg4: memref<1x8x128xf32, #tpu.memory_space<vmem>>) attributes {dimension_semantics = [#tpu.dimension_semantics<parallel>, #tpu.dimension_semantics<arbitrary>], iteration_bounds = array<i64: 1, 1>, scalar_prefetch = 0 : i64, scratch_operands = 0 : i64, tpu.core_type = #tpu.core_type<tc>, window_params = [{transform_indices = @transform_0, window_bounds = array<i64: 16, 128>}, {transform_indices = @transform_1, window_bounds = array<i64: 16, 128>}, {transform_indices = @transform_2, window_bounds = array<i64: 1, 8, 128>}]} {
    %c0_i32 = arith.constant 0 : i32
    %0 = arith.cmpi eq, %arg1, %c0_i32 : i32
    %1 = arith.extui %0 : i1 to i32
    %c0_i32_0 = arith.constant 0 : i32
    %2 = arith.cmpi ne, %1, %c0_i32_0 : i32
    scf.if %2 {
      %cst_11 = arith.constant 0.000000e+00 : f32
      %16 = vector.broadcast %cst_11 : f32 to vector<1x8x128xf32>
      %c0_12 = arith.constant 0 : index
      %c0_13 = arith.constant 0 : index
      %c0_14 = arith.constant 0 : index
      %17 = vector.load %arg4[%c0_12, %c0_13, %c0_14] : memref<1x8x128xf32, #tpu.memory_space<vmem>>, vector<1x8x128xf32>
      tpu.vector_store %arg4[%c0_12, %c0_13, %c0_14], %16 {strides = array<i32>} : memref<1x8x128xf32, #tpu.memory_space<vmem>>, vector<1x8x128xf32>,
    } else {
    }
    %c0 = arith.constant 0 : index
    %c0_1 = arith.constant 0 : index
    %3 = vector.load %arg2[%c0, %c0_1] : memref<16x128xf32, #tpu.memory_space<vmem>>, vector<16x128xf32>
    %c0_2 = arith.constant 0 : index
    %c0_3 = arith.constant 0 : index
    %4 = vector.load %arg3[%c0_2, %c0_3] : memref<16x128xf32, #tpu.memory_space<vmem>>, vector<16x128xf32>
    %5 = arith.subf %3, %4 : vector<16x128xf32>
    %6 = arith.mulf %5, %5 : vector<16x128xf32>
    %cst = arith.constant 9.99999997E-7 : f32
    %7 = vector.broadcast %cst : f32 to vector<16x128xf32>
    %8 = arith.addf %6, %7 : vector<16x128xf32>
    %9 = math.sqrt %8 : vector<16x128xf32>
    %10 = vector.shape_cast %9 : vector<16x128xf32> to vector<2x8x128xf32>
    %cst_4 = arith.constant dense<0.000000e+00> : vector<8x128xf32>
    %11 = vector.multi_reduction <add>, %10, %cst_4 [0] : vector<2x8x128xf32> to vector<8x128xf32>
    %c0_5 = arith.constant 0 : index
    %c0_6 = arith.constant 0 : index
    %c0_7 = arith.constant 0 : index
    %12 = vector.load %arg4[%c0_5, %c0_6, %c0_7] : memref<1x8x128xf32, #tpu.memory_space<vmem>>, vector<1x8x128xf32>
    %13 = vector.shape_cast %11 : vector<8x128xf32> to vector<1x8x128xf32>
    %14 = arith.addf %12, %13 : vector<1x8x128xf32>
    %c0_8 = arith.constant 0 : index
    %c0_9 = arith.constant 0 : index
    %c0_10 = arith.constant 0 : index
    %15 = vector.load %arg4[%c0_8, %c0_9, %c0_10] : memref<1x8x128xf32, #tpu.memory_space<vmem>>, vector<1x8x128xf32>
    tpu.vector_store %arg4[%c0_8, %c0_9, %c0_10], %14 {strides = array<i32>} : memref<1x8x128xf32, #tpu.memory_space<vmem>>, vector<1x8x128xf32>,
    return
  }
  func.func @transform_0(%arg0: i32, %arg1: i32) -> (i32, i32) {
    %c1_i32 = arith.constant 1 : i32
    %0 = arith.muli %arg0, %c1_i32 : i32
    %1 = arith.addi %0, %arg1 : i32
    %c0_i32 = arith.constant 0 : i32
    %2 = arith.minsi %1, %c0_i32 : i32
    %c0_i32_0 = arith.constant 0 : i32
    %c0_i32_1 = arith.constant 0 : i32
    return %2, %c0_i32_0 : i32, i32
  }
  func.func @transform_1(%arg0: i32, %arg1: i32) -> (i32, i32) {
    %c1_i32 = arith.constant 1 : i32
    %0 = arith.muli %arg0, %c1_i32 : i32
    %1 = arith.addi %0, %arg1 : i32
    %c0_i32 = arith.constant 0 : i32
    %2 = arith.minsi %1, %c0_i32 : i32
    %c0_i32_0 = arith.constant 0 : i32
    %c0_i32_1 = arith.constant 0 : i32
    return %2, %c0_i32_0 : i32, i32
  }
  func.func @transform_2(%arg0: i32, %arg1: i32) -> (i32, i32, i32) {
    %c0_i32 = arith.constant 0 : i32
    %c0_i32_0 = arith.constant 0 : i32
    %c0_i32_1 = arith.constant 0 : i32
    return %arg0, %c0_i32, %c0_i32_0 : i32, i32, i32
  }
}

</mosaic_0001>

<bundles_post_ra>
// kernel: tpu_custom_call.1
= control target key start
LH: loop header
LB: loop body
LE: loop exit
PB: predicated region body
PF: predicated region fallthrough
CT: control target
= control target key end

     0   :  { %7 = vsyncpa [#allocation3], 0  ;;  %s218_s0 = inlined_call_operand.hbm [shape: f32[16,128], index: 0, kind: input, shape index: {}]   ;;  %s219_s1 = inlined_call_operand.hbm [shape: f32[16,128], index: 1, kind: input, shape index: {}]   ;;  %s220_s2 = inlined_call_operand.hbm [shape: f32[1,8,128], index: 2, kind: output, shape index: {}]  }
   0x1   :  { %8 = vsyncpa [#allocation6], 0 }
   0x2   :  { %9 = vsyncpa [#allocation4], 0  ;;  %s189_s9 = smov [#allocation2]  }
   0x3   :  { %s21_s10 = sshll.u32 %s189_s9, 4  ;;  %s22_s10 = int_to_ptr.vmem [resolvable:$true] %s21_s10 }
   0x4   :  { %s131_s11 = scalar_lea.vmem %s22_s10, 256  ;;  %p136_p1 = scmp.lt.s32.totalorder %s22_s10, %s22_s10 }
   0x5   :  { %p132_p0 = scmp.ne.s32.totalorder %s22_s10, %s131_s11  ;;  %p137_p2 = scmp.lt.s32.totalorder %s131_s11, %s131_s11 }
   0x7   :  { %p138_p3 = por %p137_p2, %p136_p1 }
   0x9   :  { %p139_p4 = pnand %p138_p3, %p132_p0 }
   0xb   :  { %142 = shalt.err (!%p139_p4)
}
   0xc   :  { %s190_s12 = smov 128   ;;  %s191_s13 = smov 8  }
   0xd   :  { %27 = dma.hbm_to_vmem [thread:$0]  %s218_s0, 256, %s22_s10, [#allocation3], %s190_s12, %s190_s12, %s191_s13  }
   0xe   :  { %s192_s16 = smov [#allocation5]  }
   0xf   :  { %s39_s17 = sshll.u32 %s192_s16, 4  ;;  %s40_s17 = int_to_ptr.vmem [resolvable:$true] %s39_s17 }
  0x10   :  { %s151_s18 = scalar_lea.vmem %s40_s17, 256  ;;  %p156_p6 = scmp.lt.s32.totalorder %s40_s17, %s40_s17 }
  0x11   :  { %p152_p5 = scmp.ne.s32.totalorder %s40_s17, %s151_s18  ;;  %p157_p7 = scmp.lt.s32.totalorder %s151_s18, %s151_s18 }
  0x13   :  { %p158_p8 = por %p157_p7, %p156_p6 }
  0x15   :  { %p159_p9 = pnand %p158_p8, %p152_p5 }
  0x17   :  { %162 = shalt.err (!%p159_p9)
}
  0x18   :  { %45 = dma.hbm_to_vmem [thread:$0]  %s219_s1, 256, %s40_s17, [#allocation6], %s190_s12, %s190_s12, %s191_s13  }
  0x19   :  { %183 = dma.done.wait [#allocation3], 256  }
  0x1a   :  { %184 = vsyncadd [#allocation3], 4294967040 }
  0x1b   :  { %185 = dma.done.wait [#allocation6], 256  }
  0x1c   :  { %186 = vsyncadd [#allocation6], 4294967040  ;;  %v65_v0 = vld [vmem:[#allocation2] sm:$0xff]  ;;  %v66_v1 = vld [vmem:[#allocation2 + $0x8] sm:$0xff]  ;;  %s193_s0 = smov [#allocation7]  }
  0x1d   :  { %v67_v2 = vld [vmem:[#allocation5] sm:$0xff]  ;;  %v68_v3 = vld [vmem:[#allocation5 + $0x8] sm:$0xff]  ;;  %s99_s1 = sshll.u32 %s193_s0, 4  ;;  %s100_s1 = int_to_ptr.vmem [resolvable:$true] %s99_s1 }
  0x1e   :  { %v69_v4 = vsub.f32 %v65_v0, %v67_v2  ;;  %v70_v5 = vsub.f32 %v66_v1, %v68_v3  ;;  %s163_s21 = scalar_lea.vmem %s100_s1, 128  ;;  %p168_p11 = scmp.lt.s32.totalorder %s100_s1, %s100_s1 }
  0x1f   :  { %p164_p10 = scmp.ne.s32.totalorder %s100_s1, %s163_s21  ;;  %p169_p12 = scmp.lt.s32.totalorder %s163_s21, %s163_s21 }
  0x20   :  { %v71_v6 = vmul.f32 %v69_v4, %v69_v4  ;;  %v72_v7 = vmul.f32 %v70_v5, %v70_v5 }
  0x21   :  { %p170_p13 = por %p169_p12, %p168_p11 }
  0x22   :  { %v73_v8 = vadd.f32 1e-06, %v71_v6  ;;  %v74_v9 = vadd.f32 1e-06, %v72_v7 }
  0x23   :  { %p171_p0 = pnand %p170_p13, %p164_p10 }
  0x24   :  { %119 = vrsqrt.f32 %v73_v8  ;;  %vm77_vm0 = vcmp.eq.f32.partialorder %v73_v8, inf  ;;  %v80_v11 = vand.u32 2147483648, %v73_v8  ;;  %vm79_vm1 = vcmp.eq.f32.partialorder %v73_v8, 0.0 }
  0x25   :  { %121 = vrsqrt.f32 %v74_v9  ;;  %vm84_vm2 = vcmp.eq.f32.partialorder %v74_v9, inf  ;;  %v87_v14 = vand.u32 2147483648, %v74_v9  ;;  %vm86_vm3 = vcmp.eq.f32.partialorder %v74_v9, 0.0 }
  0x31   :  { %v120_v10 = vpop.eup %119 }
  0x32   :  { %v122_v12 = vpop.eup %121  ;;  %v76_v13 = vmul.f32 %v120_v10, %v73_v8 }
  0x33   :  { %v83_v15 = vmul.f32 %v122_v12, %v74_v9 }
  0x34   :  { %v78_v16 = vsel %vm77_vm0, %v73_v8, %v76_v13 }
  0x35   :  { %v81_v17 = vsel %vm79_vm1, %v80_v11, %v78_v16  ;;  %v85_v18 = vsel %vm84_vm2, %v74_v9, %v83_v15 }
  0x36   :  { %v88_v19 = vsel %vm86_vm3, %v87_v14, %v85_v18 }
  0x37   :  { %v89_v20 = vadd.f32 %v88_v19, %v81_v17 }
  0x39   :  { %92 = vst [vmem:[#allocation7] sm:$0xff] %v89_v20 }
  0x3a   :  { %174 = shalt.err (!%p171_p0)
}
  0x3b   :  { %102 = dma.vmem_to_hbm [thread:$0]  %s100_s1, 128, %s220_s2, [#allocation4]  }
  0x3c   :  { %187 = dma.done.wait [#allocation4], 128  }
  0x3d   :  { %188 = vsyncadd [#allocation4], 4294967168 }
  0x3e   :  { %106 = vsyncpa [#allocation3], 1 }
  0x3f   :  { %107 = vsyncpa [#allocation6], 1 }
  0x40   :  { %108 = vsyncpa [#allocation4], 1 }

</bundles_post_ra>
